<compile_context>
chip_gen: v6e
topology: v6e:2x2x1
jax: 0.10.0
libtpu: 0.0.40
codegen_flags: <defaults>
</compile_context>

<pallas_src>
import functools

import jax
import jax.numpy as jnp
import numpy as np
from jax.experimental import pallas as pl
from jax.experimental.pallas import tpu as pltpu

_LN_EPS = 1e-5
_INV_SQRT2 = 0.7071067811865476
# Abramowitz & Stegun 7.1.26 erf polynomial coefficients (max abs err ~1.5e-7).
_ERF_P = 0.3275911
_ERF_A1 = 0.254829592
_ERF_A2 = -0.284496736
_ERF_A3 = 1.421413741
_ERF_A4 = -1.453152027
_ERF_A5 = 1.061405429


def _erf_approx(x):
    sign = jnp.where(x >= 0.0, 1.0, -1.0)
    a = jnp.abs(x)
    t = 1.0 / (1.0 + _ERF_P * a)
    poly = t * (_ERF_A1 + t * (_ERF_A2 + t * (_ERF_A3 + t * (_ERF_A4 + t * _ERF_A5))))
    return sign * (1.0 - poly * jnp.exp(-a * a))


def _gelu(x):
    # Exact-erf GELU (matches PyTorch nn.GELU() to ~1e-6 abs).
    # TODO(synk): switch to jax.lax.erf once its Mosaic lowering is guaranteed.
    return 0.5 * x * (1.0 + _erf_approx(x * _INV_SQRT2))


def _layernorm(v, g, b):
    mu = jnp.mean(v, axis=-1, keepdims=True)
    vc = v - mu
    var = jnp.mean(vc * vc, axis=-1, keepdims=True)
    return vc * jax.lax.rsqrt(var + _LN_EPS) * g + b


def _round8(n):
    return ((n + 7) // 8) * 8


# ---------------------------------------------------------------------------
# Host-side (one-time) parameter packing: one lane-aligned slab, batch folded
# into block-diagonal token-mixing weights, column biases pre-broadcast.
# ---------------------------------------------------------------------------
def pack_mixer_params(params, batch):
    """Returns (slab, layout); layout[name] = (row_offset, rows, cols)."""
    f = lambda a: np.asarray(a, np.float32)
    tok_w1 = f(params["tok_w1"])            # (Th, P)   Linear(P, Th).weight  (out, in)
    tok_w2 = f(params["tok_w2"])            # (P, Th)   Linear(Th, P).weight  (out, in)
    ch_w1 = f(params["ch_w1"])              # (C, Ch)   Linear(C, Ch).weight.T
    ch_w2 = f(params["ch_w2"])              # (Ch, C)   Linear(Ch, C).weight.T
    conv_w = f(params["conv_w"])            # (2C, C)   Conv2d(2C,C,1).weight[:, :, 0, 0].T
    Th, P = tok_w1.shape
    C, Ch = ch_w1.shape
    BP, BTh = batch * P, batch * Th
    eye = np.eye(batch, dtype=np.float32)

    entries = [
        ("ln1_g", f(params["ln1_g"]).reshape(1, C)),
        ("ln1_b", f(params["ln1_b"]).reshape(1, C)),
        ("ln2_g", f(params["ln2_g"]).reshape(1, C)),
        ("ln2_b", f(params["ln2_b"]).reshape(1, C)),
        ("ch_b2", f(params["ch_b2"]).reshape(1, C)),
        ("conv_b", f(params["conv_b"]).reshape(1, C)),
        # pre-broadcast column biases -> plain VPU adds in the kernel
        ("tb1", np.broadcast_to(np.tile(f(params["tok_b1"]), batch)[:, None], (BTh, C)).copy()),
        ("tb2", np.broadcast_to(np.tile(f(params["tok_b2"]), batch)[:, None], (BP, C)).copy()),
        # block-diagonal token-mixing weights: batch folded into one matmul
        ("tw1", np.kron(eye, tok_w1)),       # (B*Th, B*P)
        ("tw2", np.kron(eye, tok_w2)),       # (B*P, B*Th)
        ("cw1", ch_w1),                      # (C, Ch)
        ("cb1", f(params["ch_b1"]).reshape(1, Ch)),
        ("cw2", ch_w2),                      # (Ch, C)
        ("cwa", conv_w[:C]),                 # conv half applied to x1
        ("cwb", conv_w[C:]),                 # conv half applied to x_last
    ]

    width = ((max(a.shape[1] for _, a in entries) + 127) // 128) * 128
    layout, cur = {}, 0
    for name, a in entries:
        layout[name] = (cur, a.shape[0], a.shape[1])
        cur += _round8(a.shape[0])           # keep every block 8-row aligned
    slab = np.zeros((cur, width), np.float32)
    for name, a in entries:
        r0, nr, nc = layout[name]
        slab[r0:r0 + nr, :nc] = a
    return jnp.asarray(slab), layout


# ---------------------------------------------------------------------------
# Fused kernel: whole forward (all batch elements) in one VMEM-resident pass.
# ---------------------------------------------------------------------------
def _mixer_kernel(x_ref, xl_ref, p_ref, o_ref, *, layout):
    f32 = jnp.float32

    def par(name):
        r0, nr, nc = layout[name]
        return p_ref[r0:r0 + nr, 0:nc].astype(f32)

    x = x_ref[...].astype(f32)               # (B*P, C)
    xl = xl_ref[...].astype(f32)             # (B*P, C)

    # ---- token mixing: LN, MLP over the patch dim (block-diag over batch) ----
    xn = _layernorm(x, par("ln1_g"), par("ln1_b"))                          # (B*P, C)
    h = _gelu(jnp.dot(par("tw1"), xn, preferred_element_type=f32)
              + par("tb1"))                                                 # (B*Th, C)
    x_tok = x + jnp.dot(par("tw2"), h, preferred_element_type=f32) + par("tb2")

    # ---- channel mixing: LN, MLP over the channel dim ----
    yn = _layernorm(x_tok, par("ln2_g"), par("ln2_b"))
    h2 = _gelu(jnp.dot(yn, par("cw1"), preferred_element_type=f32) + par("cb1"))  # (B*P, Ch)
    x1 = x_tok + jnp.dot(h2, par("cw2"), preferred_element_type=f32) + par("ch_b2")

    # ---- proj: 1x1 conv over concat([x1, x_last], channel) == split matmul ----
    out = (jnp.dot(x1, par("cwa"), preferred_element_type=f32)
           + jnp.dot(xl, par("cwb"), preferred_element_type=f32)
           + par("conv_b"))
    o_ref[...] = out.astype(o_ref.dtype)


def mixer_block_forward(x_self, x_last, pslab, *, layout):
    """x_self, x_last: (B, P, C); pslab/layout from pack_mixer_params."""
    B, P, C = x_self.shape
    BP = B * P
    R, W = pslab.shape
    x = x_self.reshape(BP, C)                # free: row-major contiguous
    xl = x_last.reshape(BP, C)

    out = pl.pallas_call(
        functools.partial(_mixer_kernel, layout=layout),
        out_shape=jax.ShapeDtypeStruct((BP, C), x_self.dtype),
        grid=(1,),
        in_specs=[
            pl.BlockSpec((BP, C), lambda i: (0, 0)),
            pl.BlockSpec((BP, C), lambda i: (0, 0)),
            pl.BlockSpec((R, W), lambda i: (0, 0)),
        ],
        out_specs=pl.BlockSpec((BP, C), lambda i: (0, 0)),
        compiler_params=pltpu.CompilerParams(
            dimension_semantics=("arbitrary",)),
    )(x, xl, pslab)
    return out.reshape(B, P, C)


# ---------------------------------------------------------------------------
# Pure-JAX reference (mirrors the PyTorch module semantics, exact-erf GELU)
# ---------------------------------------------------------------------------
def mixer_block_reference(x_self, x_last, p):
    def gelu(x):
        return 0.5 * x * (1.0 + jax.scipy.special.erf(x * _INV_SQRT2))

    xn = _layernorm(x_self, p["ln1_g"], p["ln1_b"])            # (B, P, C)
    xcp = jnp.swapaxes(xn, 1, 2)                               # (B, C, P)
    h = gelu(xcp @ p["tok_w1"].T + p["tok_b1"])                # (B, C, Th)
    tok_cp = h @ p["tok_w2"].T + p["tok_b2"]                   # (B, C, P)
    x_tok = x_self + jnp.swapaxes(tok_cp, 1, 2)

    yn = _layernorm(x_tok, p["ln2_g"], p["ln2_b"])
    h2 = gelu(yn @ p["ch_w1"] + p["ch_b1"])
    x1 = x_tok + h2 @ p["ch_w2"] + p["ch_b2"]

    x2 = jnp.concatenate([x1, x_last], axis=2)                 # (B, P, 2C)
    return x2 @ p["conv_w"] + p["conv_b"]


if __name__ == "__main__":
    key = jax.random.PRNGKey(0)
    # num_patches = 12 (rearranged to h=3, w=4), num_channels = 32,
    # tokens_hidden_dim = 16, channels_hidden_dim = 64
    B, P, C = 2, 12, 32
    Th, Ch = 16, 64

    keys = jax.random.split(key, 16)

    def rnd(k, shape, scale=0.05):
        return scale * jax.random.normal(k, shape, dtype=jnp.float32)

    x_self = jax.random.normal(keys[0], (B, P, C), dtype=jnp.float32)
    x_last = jax.random.normal(keys[1], (B, P, C), dtype=jnp.float32)

    params = {
        "ln1_g": jnp.ones((C,), jnp.float32),
        "ln1_b": jnp.zeros((C,), jnp.float32),
        "tok_w1": rnd(keys[2], (Th, P)),    # Linear(P, Th).weight   (out, in)
        "tok_b1": rnd(keys[3], (Th,)),
        "tok_w2": rnd(keys[4], (P, Th)),    # Linear(Th, P).weight   (out, in)
        "tok_b2": rnd(keys[5], (P,)),
        "ln2_g": jnp.ones((C,), jnp.float32) + rnd(keys[6], (C,)),
        "ln2_b": rnd(keys[7], (C,)),
        "ch_w1": rnd(keys[8], (C, Ch)),     # Linear(C, Ch).weight.T (in, out)
        "ch_b1": rnd(keys[9], (Ch,)),
        "ch_w2": rnd(keys[10], (Ch, C)),    # Linear(Ch, C).weight.T (in, out)
        "ch_b2": rnd(keys[11], (C,)),
        "conv_w": rnd(keys[12], (2 * C, C)),  # Conv2d(2C, C, 1) weight as (in, out)
        "conv_b": rnd(keys[13], (C,)),
    }

    # One-time host-side packing (block-diagonal batch fold + single slab).
    pslab, layout = pack_mixer_params(params, B)

    forward = jax.jit(functools.partial(mixer_block_forward, layout=layout))
    y = forward(x_self, x_last, pslab)
    jax.block_until_ready(y)

    y_ref = mixer_block_reference(x_self, x_last, params)
    assert y.shape == (B, P, C)
    max_err = float(jnp.max(jnp.abs(y - y_ref)))
    assert max_err < 2e-3, max_err

    print("KERNEL_OK")
</pallas_src>

<mosaic_0001>
module attributes {stable_mosaic.version = 11 : i64} {
  func.func @_mixer_kernel(%arg0: i32, %arg1: memref<24x32xf32, #tpu.memory_space<vmem>>, %arg2: memref<24x32xf32, #tpu.memory_space<vmem>>, %arg3: memref<328x128xf32, #tpu.memory_space<vmem>>, %arg4: memref<24x32xf32, #tpu.memory_space<vmem>>) attributes {dimension_semantics = [#tpu.dimension_semantics<arbitrary>], iteration_bounds = array<i64: 1>, scalar_prefetch = 0 : i64, scratch_operands = 0 : i64, tpu.core_type = #tpu.core_type<tc>, window_params = [{pipeline_mode = #tpu.pipeline_mode<synchronous>, transform_indices = @transform_0, window_bounds = array<i64: 24, 32>}, {pipeline_mode = #tpu.pipeline_mode<synchronous>, transform_indices = @transform_1, window_bounds = array<i64: 24, 32>}, {pipeline_mode = #tpu.pipeline_mode<synchronous>, transform_indices = @transform_2, window_bounds = array<i64: 328, 128>}, {pipeline_mode = #tpu.pipeline_mode<synchronous>, transform_indices = @transform_3, window_bounds = array<i64: 24, 32>}]} {
    %c0 = arith.constant 0 : index
    %c0_0 = arith.constant 0 : index
    %0 = vector.load %arg1[%c0, %c0_0] : memref<24x32xf32, #tpu.memory_space<vmem>>, vector<24x32xf32>
    %c0_1 = arith.constant 0 : index
    %c0_2 = arith.constant 0 : index
    %1 = vector.load %arg2[%c0_1, %c0_2] : memref<24x32xf32, #tpu.memory_space<vmem>>, vector<24x32xf32>
    %c0_3 = arith.constant 0 : index
    %c0_4 = arith.constant 0 : index
    %2 = vector.load %arg3[%c0_3, %c0_4] : memref<328x128xf32, #tpu.memory_space<vmem>>, vector<1x32xf32>
    %c8 = arith.constant 8 : index
    %c0_5 = arith.constant 0 : index
    %3 = vector.load %arg3[%c8, %c0_5] : memref<328x128xf32, #tpu.memory_space<vmem>>, vector<1x32xf32>
    %cst = arith.constant dense<0.000000e+00> : vector<24xf32>
    %4 = vector.multi_reduction <add>, %0, %cst [1] : vector<24x32xf32> to vector<24xf32>
    %5 = vector.shape_cast %4 : vector<24xf32> to vector<24x1xf32>
    %cst_6 = arith.constant 3.200000e+01 : f32
    %6 = vector.broadcast %cst_6 : f32 to vector<24x1xf32>
    %7 = arith.divf %5, %6 : vector<24x1xf32>
    %8 = vector.broadcast %7 : vector<24x1xf32> to vector<24x32xf32>
    %9 = arith.subf %0, %8 : vector<24x32xf32>
    %10 = arith.mulf %9, %9 : vector<24x32xf32>
    %cst_7 = arith.constant dense<0.000000e+00> : vector<24xf32>
    %11 = vector.multi_reduction <add>, %10, %cst_7 [1] : vector<24x32xf32> to vector<24xf32>
    %12 = vector.shape_cast %11 : vector<24xf32> to vector<24x1xf32>
    %cst_8 = arith.constant 3.200000e+01 : f32
    %13 = vector.broadcast %cst_8 : f32 to vector<24x1xf32>
    %14 = arith.divf %12, %13 : vector<24x1xf32>
    %cst_9 = arith.constant 9.99999974E-6 : f32
    %15 = vector.broadcast %cst_9 : f32 to vector<24x1xf32>
    %16 = arith.addf %14, %15 : vector<24x1xf32>
    %17 = math.rsqrt %16 : vector<24x1xf32>
    %18 = vector.broadcast %17 : vector<24x1xf32> to vector<24x32xf32>
    %19 = arith.mulf %9, %18 : vector<24x32xf32>
    %20 = vector.broadcast %2 : vector<1x32xf32> to vector<24x32xf32>
    %21 = arith.mulf %19, %20 : vector<24x32xf32>
    %22 = vector.broadcast %3 : vector<1x32xf32> to vector<24x32xf32>
    %23 = arith.addf %21, %22 : vector<24x32xf32>
    %c104 = arith.constant 104 : index
    %c0_10 = arith.constant 0 : index
    %24 = vector.load %arg3[%c104, %c0_10] : memref<328x128xf32, #tpu.memory_space<vmem>>, vector<32x24xf32>
    %cst_11 = arith.constant dense<0.000000e+00> : vector<32x32xf32>
    %25 = tpu.matmul %24, %23, %cst_11 {dimension_numbers = #tpu.dot_dimension_numbers<[1], [0], [0], [1], [0, 0, 1, 1], [], []>} : vector<32x24xf32>, vector<24x32xf32>, vector<32x32xf32> -> vector<32x32xf32>
    %c48 = arith.constant 48 : index
    %c0_12 = arith.constant 0 : index
    %26 = vector.load %arg3[%c48, %c0_12] : memref<328x128xf32, #tpu.memory_space<vmem>>, vector<32x32xf32>
    %27 = arith.addf %25, %26 : vector<32x32xf32>
    %cst_13 = arith.constant 5.000000e-01 : f32
    %28 = vector.broadcast %cst_13 : f32 to vector<32x32xf32>
    %29 = arith.mulf %28, %27 : vector<32x32xf32>
    %cst_14 = arith.constant 0.707106769 : f32
    %30 = vector.broadcast %cst_14 : f32 to vector<32x32xf32>
    %31 = arith.mulf %27, %30 : vector<32x32xf32>
    %cst_15 = arith.constant 0.000000e+00 : f32
    %32 = vector.broadcast %cst_15 : f32 to vector<32x32xf32>
    %33 = arith.cmpf oge, %31, %32 : vector<32x32xf32>
    %cst_16 = arith.constant 1.000000e+00 : f32
    %cst_17 = arith.constant -1.000000e+00 : f32
    %34 = vector.broadcast %cst_16 : f32 to vector<32x32xf32>
    %35 = vector.broadcast %cst_17 : f32 to vector<32x32xf32>
    %36 = arith.select %33, %34, %35 : vector<32x32xi1>, vector<32x32xf32>
    %37 = math.absf %31 : vector<32x32xf32>
    %cst_18 = arith.constant 0.327591091 : f32
    %38 = vector.broadcast %cst_18 : f32 to vector<32x32xf32>
    %39 = arith.mulf %38, %37 : vector<32x32xf32>
    %cst_19 = arith.constant 1.000000e+00 : f32
    %40 = vector.broadcast %cst_19 : f32 to vector<32x32xf32>
    %41 = arith.addf %40, %39 : vector<32x32xf32>
    %cst_20 = arith.constant 1.000000e+00 : f32
    %42 = vector.broadcast %cst_20 : f32 to vector<32x32xf32>
    %43 = arith.divf %42, %41 : vector<32x32xf32>
    %cst_21 = arith.constant 1.06140542 : f32
    %44 = vector.broadcast %cst_21 : f32 to vector<32x32xf32>
    %45 = arith.mulf %43, %44 : vector<32x32xf32>
    %cst_22 = arith.constant -1.45315206 : f32
    %46 = vector.broadcast %cst_22 : f32 to vector<32x32xf32>
    %47 = arith.addf %46, %45 : vector<32x32xf32>
    %48 = arith.mulf %43, %47 : vector<32x32xf32>
    %cst_23 = arith.constant 1.42141378 : f32
    %49 = vector.broadcast %cst_23 : f32 to vector<32x32xf32>
    %50 = arith.addf %49, %48 : vector<32x32xf32>
    %51 = arith.mulf %43, %50 : vector<32x32xf32>
    %cst_24 = arith.constant -0.284496725 : f32
    %52 = vector.broadcast %cst_24 : f32 to vector<32x32xf32>
    %53 = arith.addf %52, %51 : vector<32x32xf32>
    %54 = arith.mulf %43, %53 : vector<32x32xf32>
    %cst_25 = arith.constant 0.254829586 : f32
    %55 = vector.broadcast %cst_25 : f32 to vector<32x32xf32>
    %56 = arith.addf %55, %54 : vector<32x32xf32>
    %57 = arith.mulf %43, %56 : vector<32x32xf32>
    %cst_26 = arith.constant 0.000000e+00 : f32
    %58 = vector.broadcast %cst_26 : f32 to vector<32x32xf32>
    %59 = arith.subf %58, %37 : vector<32x32xf32>
    %60 = arith.mulf %59, %37 : vector<32x32xf32>
    %61 = math.exp %60 : vector<32x32xf32>
    %62 = arith.mulf %57, %61 : vector<32x32xf32>
    %cst_27 = arith.constant 1.000000e+00 : f32
    %63 = vector.broadcast %cst_27 : f32 to vector<32x32xf32>
    %64 = arith.subf %63, %62 : vector<32x32xf32>
    %65 = arith.mulf %36, %64 : vector<32x32xf32>
    %cst_28 = arith.constant 1.000000e+00 : f32
    %66 = vector.broadcast %cst_28 : f32 to vector<32x32xf32>
    %67 = arith.addf %66, %65 : vector<32x32xf32>
    %68 = arith.mulf %29, %67 : vector<32x32xf32>
    %c136 = arith.constant 136 : index
    %c0_29 = arith.constant 0 : index
    %69 = vector.load %arg3[%c136, %c0_29] : memref<328x128xf32, #tpu.memory_space<vmem>>, vector<24x32xf32>
    %cst_30 = arith.constant dense<0.000000e+00> : vector<24x32xf32>
    %70 = tpu.matmul %69, %68, %cst_30 {dimension_numbers = #tpu.dot_dimension_numbers<[1], [0], [0], [1], [0, 0, 1, 1], [], []>} : vector<24x32xf32>, vector<32x32xf32>, vector<24x32xf32> -> vector<24x32xf32>
    %71 = arith.addf %0, %70 : vector<24x32xf32>
    %c80 = arith.constant 80 : index
    %c0_31 = arith.constant 0 : index
    %72 = vector.load %arg3[%c80, %c0_31] : memref<328x128xf32, #tpu.memory_space<vmem>>, vector<24x32xf32>
    %73 = arith.addf %71, %72 : vector<24x32xf32>
    %c16 = arith.constant 16 : index
    %c0_32 = arith.constant 0 : index
    %74 = vector.load %arg3[%c16, %c0_32] : memref<328x128xf32, #tpu.memory_space<vmem>>, vector<1x32xf32>
    %c24 = arith.constant 24 : index
    %c0_33 = arith.constant 0 : index
    %75 = vector.load %arg3[%c24, %c0_33] : memref<328x128xf32, #tpu.memory_space<vmem>>, vector<1x32xf32>
    %cst_34 = arith.constant dense<0.000000e+00> : vector<24xf32>
    %76 = vector.multi_reduction <add>, %73, %cst_34 [1] : vector<24x32xf32> to vector<24xf32>
    %77 = vector.shape_cast %76 : vector<24xf32> to vector<24x1xf32>
    %cst_35 = arith.constant 3.200000e+01 : f32
    %78 = vector.broadcast %cst_35 : f32 to vector<24x1xf32>
    %79 = arith.divf %77, %78 : vector<24x1xf32>
    %80 = vector.broadcast %79 : vector<24x1xf32> to vector<24x32xf32>
    %81 = arith.subf %73, %80 : vector<24x32xf32>
    %82 = arith.mulf %81, %81 : vector<24x32xf32>
    %cst_36 = arith.constant dense<0.000000e+00> : vector<24xf32>
    %83 = vector.multi_reduction <add>, %82, %cst_36 [1] : vector<24x32xf32> to vector<24xf32>
    %84 = vector.shape_cast %83 : vector<24xf32> to vector<24x1xf32>
    %cst_37 = arith.constant 3.200000e+01 : f32
    %85 = vector.broadcast %cst_37 : f32 to vector<24x1xf32>
    %86 = arith.divf %84, %85 : vector<24x1xf32>
    %cst_38 = arith.constant 9.99999974E-6 : f32
    %87 = vector.broadcast %cst_38 : f32 to vector<24x1xf32>
    %88 = arith.addf %86, %87 : vector<24x1xf32>
    %89 = math.rsqrt %88 : vector<24x1xf32>
    %90 = vector.broadcast %89 : vector<24x1xf32> to vector<24x32xf32>
    %91 = arith.mulf %81, %90 : vector<24x32xf32>
    %92 = vector.broadcast %74 : vector<1x32xf32> to vector<24x32xf32>
    %93 = arith.mulf %91, %92 : vector<24x32xf32>
    %94 = vector.broadcast %75 : vector<1x32xf32> to vector<24x32xf32>
    %95 = arith.addf %93, %94 : vector<24x32xf32>
    %c160 = arith.constant 160 : index
    %c0_39 = arith.constant 0 : index
    %96 = vector.load %arg3[%c160, %c0_39] : memref<328x128xf32, #tpu.memory_space<vmem>>, vector<32x64xf32>
    %cst_40 = arith.constant dense<0.000000e+00> : vector<24x64xf32>
    %97 = tpu.matmul %95, %96, %cst_40 {dimension_numbers = #tpu.dot_dimension_numbers<[1], [0], [0], [1], [0, 0, 1, 1], [], []>} : vector<24x32xf32>, vector<32x64xf32>, vector<24x64xf32> -> vector<24x64xf32>
    %c192 = arith.constant 192 : index
    %c0_41 = arith.constant 0 : index
    %98 = vector.load %arg3[%c192, %c0_41] : memref<328x128xf32, #tpu.memory_space<vmem>>, vector<1x64xf32>
    %99 = vector.broadcast %98 : vector<1x64xf32> to vector<24x64xf32>
    %100 = arith.addf %97, %99 : vector<24x64xf32>
    %cst_42 = arith.constant 5.000000e-01 : f32
    %101 = vector.broadcast %cst_42 : f32 to vector<24x64xf32>
    %102 = arith.mulf %101, %100 : vector<24x64xf32>
    %cst_43 = arith.constant 0.707106769 : f32
    %103 = vector.broadcast %cst_43 : f32 to vector<24x64xf32>
    %104 = arith.mulf %100, %103 : vector<24x64xf32>
    %cst_44 = arith.constant 0.000000e+00 : f32
    %105 = vector.broadcast %cst_44 : f32 to vector<24x64xf32>
    %106 = arith.cmpf oge, %104, %105 : vector<24x64xf32>
    %cst_45 = arith.constant 1.000000e+00 : f32
    %cst_46 = arith.constant -1.000000e+00 : f32
    %107 = vector.broadcast %cst_45 : f32 to vector<24x64xf32>
    %108 = vector.broadcast %cst_46 : f32 to vector<24x64xf32>
    %109 = arith.select %106, %107, %108 : vector<24x64xi1>, vector<24x64xf32>
    %110 = math.absf %104 : vector<24x64xf32>
    %cst_47 = arith.constant 0.327591091 : f32
    %111 = vector.broadcast %cst_47 : f32 to vector<24x64xf32>
    %112 = arith.mulf %111, %110 : vector<24x64xf32>
    %cst_48 = arith.constant 1.000000e+00 : f32
    %113 = vector.broadcast %cst_48 : f32 to vector<24x64xf32>
    %114 = arith.addf %113, %112 : vector<24x64xf32>
    %cst_49 = arith.constant 1.000000e+00 : f32
    %115 = vector.broadcast %cst_49 : f32 to vector<24x64xf32>
    %116 = arith.divf %115, %114 : vector<24x64xf32>
    %cst_50 = arith.constant 1.06140542 : f32
    %117 = vector.broadcast %cst_50 : f32 to vector<24x64xf32>
    %118 = arith.mulf %116, %117 : vector<24x64xf32>
    %cst_51 = arith.constant -1.45315206 : f32
    %119 = vector.broadcast %cst_51 : f32 to vector<24x64xf32>
    %120 = arith.addf %119, %118 : vector<24x64xf32>
    %121 = arith.mulf %116, %120 : vector<24x64xf32>
    %cst_52 = arith.constant 1.42141378 : f32
    %122 = vector.broadcast %cst_52 : f32 to vector<24x64xf32>
    %123 = arith.addf %122, %121 : vector<24x64xf32>
    %124 = arith.mulf %116, %123 : vector<24x64xf32>
    %cst_53 = arith.constant -0.284496725 : f32
    %125 = vector.broadcast %cst_53 : f32 to vector<24x64xf32>
    %126 = arith.addf %125, %124 : vector<24x64xf32>
    %127 = arith.mulf %116, %126 : vector<24x64xf32>
    %cst_54 = arith.constant 0.254829586 : f32
    %128 = vector.broadcast %cst_54 : f32 to vector<24x64xf32>
    %129 = arith.addf %128, %127 : vector<24x64xf32>
    %130 = arith.mulf %116, %129 : vector<24x64xf32>
    %cst_55 = arith.constant 0.000000e+00 : f32
    %131 = vector.broadcast %cst_55 : f32 to vector<24x64xf32>
    %132 = arith.subf %131, %110 : vector<24x64xf32>
    %133 = arith.mulf %132, %110 : vector<24x64xf32>
    %134 = math.exp %133 : vector<24x64xf32>
    %135 = arith.mulf %130, %134 : vector<24x64xf32>
    %cst_56 = arith.constant 1.000000e+00 : f32
    %136 = vector.broadcast %cst_56 : f32 to vector<24x64xf32>
    %137 = arith.subf %136, %135 : vector<24x64xf32>
    %138 = arith.mulf %109, %137 : vector<24x64xf32>
    %cst_57 = arith.constant 1.000000e+00 : f32
    %139 = vector.broadcast %cst_57 : f32 to vector<24x64xf32>
    %140 = arith.addf %139, %138 : vector<24x64xf32>
    %141 = arith.mulf %102, %140 : vector<24x64xf32>
    %c200 = arith.constant 200 : index
    %c0_58 = arith.constant 0 : index
    %142 = vector.load %arg3[%c200, %c0_58] : memref<328x128xf32, #tpu.memory_space<vmem>>, vector<64x32xf32>
    %cst_59 = arith.constant dense<0.000000e+00> : vector<24x32xf32>
    %143 = tpu.matmul %141, %142, %cst_59 {dimension_numbers = #tpu.dot_dimension_numbers<[1], [0], [0], [1], [0, 0, 1, 1], [], []>} : vector<24x64xf32>, vector<64x32xf32>, vector<24x32xf32> -> vector<24x32xf32>
    %144 = arith.addf %73, %143 : vector<24x32xf32>
    %c32 = arith.constant 32 : index
    %c0_60 = arith.constant 0 : index
    %145 = vector.load %arg3[%c32, %c0_60] : memref<328x128xf32, #tpu.memory_space<vmem>>, vector<1x32xf32>
    %146 = vector.broadcast %145 : vector<1x32xf32> to vector<24x32xf32>
    %147 = arith.addf %144, %146 : vector<24x32xf32>
    %c264 = arith.constant 264 : index
    %c0_61 = arith.constant 0 : index
    %148 = vector.load %arg3[%c264, %c0_61] : memref<328x128xf32, #tpu.memory_space<vmem>>, vector<32x32xf32>
    %cst_62 = arith.constant dense<0.000000e+00> : vector<24x32xf32>
    %149 = tpu.matmul %147, %148, %cst_62 {dimension_numbers = #tpu.dot_dimension_numbers<[1], [0], [0], [1], [0, 0, 1, 1], [], []>} : vector<24x32xf32>, vector<32x32xf32>, vector<24x32xf32> -> vector<24x32xf32>
    %c296 = arith.constant 296 : index
    %c0_63 = arith.constant 0 : index
    %150 = vector.load %arg3[%c296, %c0_63] : memref<328x128xf32, #tpu.memory_space<vmem>>, vector<32x32xf32>
    %cst_64 = arith.constant dense<0.000000e+00> : vector<24x32xf32>
    %151 = tpu.matmul %1, %150, %cst_64 {dimension_numbers = #tpu.dot_dimension_numbers<[1], [0], [0], [1], [0, 0, 1, 1], [], []>} : vector<24x32xf32>, vector<32x32xf32>, vector<24x32xf32> -> vector<24x32xf32>
    %152 = arith.addf %149, %151 : vector<24x32xf32>
    %c40 = arith.constant 40 : index
    %c0_65 = arith.constant 0 : index
    %153 = vector.load %arg3[%c40, %c0_65] : memref<328x128xf32, #tpu.memory_space<vmem>>, vector<1x32xf32>
    %154 = vector.broadcast %153 : vector<1x32xf32> to vector<24x32xf32>
    %155 = arith.addf %152, %154 : vector<24x32xf32>
    %c0_66 = arith.constant 0 : index
    %c0_67 = arith.constant 0 : index
    %156 = vector.load %arg4[%c0_66, %c0_67] : memref<24x32xf32, #tpu.memory_space<vmem>>, vector<24x32xf32>
    tpu.vector_store %arg4[%c0_66, %c0_67], %155 {strides = array<i32>} : memref<24x32xf32, #tpu.memory_space<vmem>>, vector<24x32xf32>,
    return
  }
  func.func @transform_0(%arg0: i32) -> (i32, i32) {
    %c0_i32 = arith.constant 0 : i32
    %c0_i32_0 = arith.constant 0 : i32
    %c0_i32_1 = arith.constant 0 : i32
    return %c0_i32, %c0_i32_0 : i32, i32
  }
  func.func @transform_1(%arg0: i32) -> (i32, i32) {
    %c0_i32 = arith.constant 0 : i32
    %c0_i32_0 = arith.constant 0 : i32
    %c0_i32_1 = arith.constant 0 : i32
    return %c0_i32, %c0_i32_0 : i32, i32
  }
  func.func @transform_2(%arg0: i32) -> (i32, i32) {
    %c0_i32 = arith.constant 0 : i32
    %c0_i32_0 = arith.constant 0 : i32
    %c0_i32_1 = arith.constant 0 : i32
    return %c0_i32, %c0_i32_0 : i32, i32
  }
  func.func @transform_3(%arg0: i32) -> (i32, i32) {
    %c0_i32 = arith.constant 0 : i32
    %c0_i32_0 = arith.constant 0 : i32
    %c0_i32_1 = arith.constant 0 : i32
    return %c0_i32, %c0_i32_0 : i32, i32
  }
}

</mosaic_0001>

<bundles_post_ra>
// kernel: mixer_block_forward.1
= control target key start
LH: loop header
LB: loop body
LE: loop exit
PB: predicated region body
PF: predicated region fallthrough
CT: control target
= control target key end

     0   :  { %8 = vsyncpa [#allocation3], 0  ;;  %s1204_s12 = smov [#allocation2]   ;;  %s1449_s0 = inlined_call_operand.vmem [shape: f32[24,32], index: 0, kind: input, shape index: {}]   ;;  %s1450_s1 = inlined_call_operand.vmem [shape: f32[24,32], index: 1, kind: input, shape index: {}]   ;;  %s1451_s2 = inlined_call_operand.hbm [shape: f32[328,128], index: 2, kind: input, shape index: {}]   ;;  %s1452_s3 = inlined_call_operand.vmem [shape: f32[24,32], index: 3, kind: output, shape index: {}]  }
   0x1   :  { %s18_s13 = sshll.u32 %s1204_s12, 4  ;;  %s19_s13 = int_to_ptr.vmem [resolvable:$true] %s18_s13 }
   0x2   :  { %s1190_s14 = scalar_lea.vmem %s19_s13, 5248  ;;  %p1195_p1 = scmp.lt.s32.totalorder %s19_s13, %s19_s13 }
   0x3   :  { %p1191_p0 = scmp.ne.s32.totalorder %s19_s13, %s1190_s14  ;;  %p1196_p2 = scmp.lt.s32.totalorder %s1190_s14, %s1190_s14 }
   0x5   :  { %p1197_p3 = por %p1196_p2, %p1195_p1 }
   0x7   :  { %p1198_p4 = pnand %p1197_p3, %p1191_p0 }
   0x9   :  { %1201 = shalt.err (!%p1198_p4)
}
   0xa   :  { %s1205_s15 = smov 128   ;;  %s1206_s16 = smov 8  }
   0xb   :  { %24 = dma.hbm_to_vmem [thread:$0]  %s1451_s2, 5248, %s19_s13, [#allocation3], %s1205_s15, %s1205_s15, %s1206_s16  }
   0xc   :  { %1202 = dma.done.wait [#allocation3], 5248  }
   0xd   :  { %1203 = vsyncadd [#allocation3], 4294962048  ;;  %vm36_vm0 = vcmask 261120   ;;  %v1236_v0 = vld [vmem:[%s1449_s0 + $0x10] sm:$0xff]  ;;  %v1241_v1 = vld [vmem:[%s1449_s0 + $0x8] sm:$0xff]  ;;  %vm99_vm1 = vcmask 195584  }
   0xe   :  { %v1246_v2 = vld [vmem:[%s1449_s0] sm:$0xff]  ;;  %v43_v3 = vsel %vm36_vm0, %v1236_v0, 0.0  ;;  %v40_v5 = vsel %vm36_vm0, %v1241_v1, 0.0  ;;  %v91_v21 = vld [vmem:[#allocation2 + $0x68] sm:$0xff]  ;;  %v92_v45 = vld [vmem:[#allocation2 + $0x70] sm:$0xff]  ;;  %v1207_v48 = vmov 0.0  }
   0xf   :  { %v37_v4 = vsel %vm36_vm0, %v1246_v2, 0.0  ;;  %44 = vadd.xlane.f32.xlu0 %v43_v3  ;;  %1029 = vmatprep.mubr.msk.f32.mxu0 %vm99_vm1, %v91_v21  ;;  %v951_v32 = vld [vmem:[#allocation2] ss:$0 sm:$0xff]  ;;  %v952_v34 = vld [vmem:[#allocation2 + $0x8] ss:$0 sm:$0xff]  ;;  %v93_v46 = vld [vmem:[#allocation2 + $0x78] sm:$0xff] }
  0x10   :  { %38 = vadd.xlane.f32.xlu1 %v37_v4  ;;  %v94_v47 = vld [vmem:[#allocation2 + $0x80] sm:$0xff]  ;;  %1035 = vmatprep.subr.mxu1 %v1207_v48  ;;  %vm1208_vm2 = vmmov 0   ;;  %v96_v49 = vld [vmem:[#allocation2 + $0x38] sm:$0xff]  ;;  %v95_v51 = vld [vmem:[#allocation2 + $0x30] sm:$0xff]  ;;  %vm648_vm9 = vcmask 523264  }
  0x11   :  { %1043 = vmatprep.mubr.msk.f32.mxu1 %vm1208_vm2, %v1207_v48  ;;  %v98_v56 = vld [vmem:[#allocation2 + $0x48] sm:$0xff]  ;;  %v97_v60 = vld [vmem:[#allocation2 + $0x40] sm:$0xff] }
  0x13   :  { %41 = vadd.xlane.f32.xlu0 %v40_v5 }
  0x98   :  { %v45_v6 = vpop.xlane.xlu0 %44 }
  0x99   :  { %v39_v7 = vpop.xlane.xlu1 %38  ;;  %v49_v8 = vmul.f32 0.03125, %v45_v6 }
  0x9a   :  { %v47_v9 = vmul.f32 0.03125, %v39_v7 }
  0x9b   :  { %v52_v10 = vsub.f32 %v1236_v0, %v49_v8 }
  0x9c   :  { %v50_v11 = vsub.f32 %v1246_v2, %v47_v9  ;;  %v42_v12 = vpop.xlane.xlu0 %41 }
  0x9d   :  { %v48_v13 = vmul.f32 0.03125, %v42_v12  ;;  %v55_v14 = vmul.f32 %v52_v10, %v52_v10 }
  0x9e   :  { %v53_v15 = vmul.f32 %v50_v11, %v50_v11 }
  0x9f   :  { %v51_v16 = vsub.f32 %v1241_v1, %v48_v13  ;;  %v62_v17 = vsel %vm36_vm0, %v55_v14, 0.0 }
  0xa0   :  { %63 = vadd.xlane.f32.xlu1 %v62_v17  ;;  %v56_v19 = vsel %vm36_vm0, %v53_v15, 0.0 }
  0xa1   :  { %v54_v18 = vmul.f32 %v51_v16, %v51_v16 }
  0xa3   :  { %v59_v20 = vsel %vm36_vm0, %v54_v18, 0.0 }
  0xa4   :  { %60 = vadd.xlane.f32.xlu0 %v59_v20  ;;  %57 = vadd.xlane.f32.xlu1 %v56_v19 }
 0x129   :  { %v64_v22 = vpop.xlane.xlu1 %63 }
 0x12a   :  { %v67_v23 = vmul.f32 0.03125, %v64_v22 }
 0x12c   :  { %v70_v24 = vadd.f32 1e-05, %v67_v23 }
 0x12d   :  { %v61_v25 = vpop.xlane.xlu0 %60  ;;  %v58_v26 = vpop.xlane.xlu1 %57 }
 0x12e   :  { %1142 = vrsqrt.f32 %v70_v24  ;;  %v66_v27 = vmul.f32 0.03125, %v61_v25  ;;  %v65_v28 = vmul.f32 0.03125, %v58_v26 }
 0x130   :  { %v69_v29 = vadd.f32 1e-05, %v66_v27  ;;  %v68_v30 = vadd.f32 1e-05, %v65_v28 }
 0x132   :  { %1144 = vrsqrt.f32 %v69_v29 }
 0x133   :  { %1146 = vrsqrt.f32 %v68_v30 }
 0x13b   :  { %v1143_v31 = vpop.eup %1142 }
 0x13c   :  { %v76_v33 = vmul.f32 %v1143_v31, %v52_v10 }
 0x13e   :  { %v83_v35 = vmul.f32 %v951_v32, %v76_v33 }
 0x13f   :  { %v1145_v36 = vpop.eup %1144 }
 0x140   :  { %v1147_v37 = vpop.eup %1146  ;;  %v90_v38 = vadd.f32 %v952_v34, %v83_v35  ;;  %v75_v39 = vmul.f32 %v1145_v36, %v51_v16 }
 0x141   :  { %v74_v40 = vmul.f32 %v1147_v37, %v50_v11 }
 0x142   :  { %1023 = vmatprep.subr.mxu0 %v90_v38  ;;  %v82_v41 = vmul.f32 %v951_v32, %v75_v39 }
 0x143   :  { %1024 = vmatpush3.msra.mxu0 %v90_v38  ;;  %v81_v42 = vmul.f32 %v951_v32, %v74_v40 }
 0x144   :  { %v89_v43 = vadd.f32 %v952_v34, %v82_v41 }
 0x145   :  { %v88_v44 = vadd.f32 %v952_v34, %v81_v42 }
 0x146   :  { %1025 = vmatprep.subr.mxu0 %v89_v43 }
 0x147   :  { %1026 = vmatpush3.msra.mxu0 %v89_v43 }
 0x148   :  { %1027 = vmatprep.subr.mxu0 %v88_v44 }
 0x149   :  { %1028 = vmatpush3.msra.mxu0 %v88_v44 }
 0x14a   :  { %1030 = vmatmul.mubr.msk.f32.vlgmr.msra.gmra.mxu0 %vm99_vm1, %v92_v45  ;;  %1052 = vmatprep.subr.mxu0 %v1207_v48 }
 0x14b   :  { %1032 = vmatprep.mubr.msk.f32.mxu0 %vm99_vm1, %v93_v46 }
 0x14e   :  { %1033 = vmatmul.mubr.msk.f32.gmra.mxu0 %vm99_vm1, %v94_v47 }
 0x14f   :  { %1060 = vmatprep.mubr.msk.f32.mxu0 %vm1208_vm2, %v1207_v48 }
 0x20a   :  { %v1031_v50 = vpop.f32.mrf.mxu0 }
 0x20b   :  { %v1270_v52 = vadd.f32 %v1031_v50, %v96_v49 }
 0x20c   :  { %v178_v53 = vpop.f32.mrf.mxu0 }
 0x20d   :  { %v1273_v54 = vmul.f32 0.70710677, %v1270_v52  ;;  %v1275_v55 = vadd.f32 %v178_v53, %v95_v51 }
 0x20e   :  { %v1034_v57 = vpop.f32.mrf.mxu0 }
 0x20f   :  { %v214_v58 = vand.u32 2147483647, %v1273_v54  ;;  %v1279_v59 = vmul.f32 0.70710677, %v1275_v55  ;;  %v1281_v61 = vadd.f32 %v1034_v57, %v98_v56  ;;  %vm206_vm4 = vcmp.ge.f32.partialorder %v1273_v54, 0.0 }
 0x210   :  { %v188_v62 = vpop.f32.mrf.mxu0 }
 0x211   :  { %v218_v63 = vmul.f32 0.3275911, %v214_v58  ;;  %v213_v3 = vand.u32 2147483647, %v1279_v59  ;;  %v1285_v4 = vmul.f32 0.70710677, %v1281_v61  ;;  %v1287_v5 = vadd.f32 %v188_v62, %v97_v60 }
 0x212   :  { %v270_v16 = vsub.f32 0.0, %v214_v58  ;;  %vm205_vm5 = vcmp.ge.f32.partialorder %v1279_v59, 0.0 }
 0x213   :  { %v222_v6 = vadd.f32 1.0, %v218_v63  ;;  %v217_v7 = vmul.f32 0.3275911, %v213_v3  ;;  %v216_v8 = vand.u32 2147483647, %v1285_v4  ;;  %v269_v17 = vsub.f32 0.0, %v213_v3 }
 0x214   :  { %v1291_v9 = vmul.f32 0.70710677, %v1287_v5  ;;  %v274_v19 = vmul.f32 %v270_v16, %v214_v58  ;;  %vm208_vm3 = vcmp.ge.f32.partialorder %v1285_v4, 0.0 }
 0x215   :  { %1148 = vrcp.f32 %v222_v6  ;;  %v221_v10 = vadd.f32 1.0, %v217_v7  ;;  %v220_v11 = vmul.f32 0.3275911, %v216_v8  ;;  %v272_v18 = vsub.f32 0.0, %v216_v8 }
 0x216   :  { %v215_v12 = vand.u32 2147483647, %v1291_v9  ;;  %v273_v21 = vmul.f32 %v269_v17, %v213_v3  ;;  %v279_v26 = vmul.f32 1.442695, %v274_v19  ;;  %vm207_vm6 = vcmp.ge.f32.partialorder %v1291_v9, 0.0 }
 0x217   :  { %1150 = vrcp.f32 %v221_v10  ;;  %v224_v13 = vadd.f32 1.0, %v220_v11  ;;  %v276_v24 = vmul.f32 %v272_v18, %v216_v8 }
 0x218   :  { %v219_v14 = vmul.f32 0.3275911, %v215_v12  ;;  %v271_v22 = vsub.f32 0.0, %v215_v12  ;;  %v277_v30 = vmul.f32 1.442695, %v273_v21 }
 0x219   :  { %1152 = vrcp.f32 %v224_v13  ;;  %v283_v33 = vmul.f32 1.442695, %v276_v24 }
 0x21a   :  { %v223_v15 = vadd.f32 1.0, %v219_v14  ;;  %v275_v31 = vmul.f32 %v271_v22, %v215_v12 }
 0x21c   :  { %1154 = vrcp.f32 %v223_v15  ;;  %v281_v40 = vmul.f32 1.442695, %v275_v31 }
 0x21d   :  { %1156 = vpow2.f32 %v279_v26 }
 0x21e   :  { %1158 = vpow2.f32 %v277_v30 }
 0x21f   :  { %1160 = vpow2.f32 %v283_v33 }
 0x220   :  { %1162 = vpow2.f32 %v281_v40 }
 0x222   :  { %v1149_v20 = vpop.eup %1148 }
 0x223   :  { %v234_v23 = vmul.f32 1.0614054, %v1149_v20 }
 0x224   :  { %v1151_v25 = vpop.eup %1150 }
 0x225   :  { %v238_v27 = vadd.f32 -1.4531521, %v234_v23  ;;  %v233_v28 = vmul.f32 1.0614054, %v1151_v25 }
 0x226   :  { %v1153_v29 = vpop.eup %1152 }
 0x227   :  { %v242_v32 = vmul.f32 %v1149_v20, %v238_v27  ;;  %v236_v34 = vmul.f32 1.0614054, %v1153_v29  ;;  %v237_v35 = vadd.f32 -1.4531521, %v233_v28 }
 0x229   :  { %v246_v36 = vadd.f32 1.4214138, %v242_v32  ;;  %v1155_v37 = vpop.eup %1154  ;;  %v240_v38 = vadd.f32 -1.4531521, %v236_v34  ;;  %v241_v39 = vmul.f32 %v1151_v25, %v237_v35  ;;  %v200_v32 = vmul.f32 0.5, %v1281_v61 }
 0x22a   :  { %v235_v41 = vmul.f32 1.0614054, %v1155_v37  ;;  %v1157_v10 = vpop.eup %1156 }
 0x22b   :  { %v250_v42 = vmul.f32 %v1149_v20, %v246_v36  ;;  %v244_v43 = vmul.f32 %v1153_v29, %v240_v38  ;;  %v245_v44 = vadd.f32 1.4214138, %v241_v39  ;;  %v1159_v15 = vpop.eup %1158  ;;  %v199_v36 = vmul.f32 0.5, %v1287_v5 }
 0x22c   :  { %v239_v45 = vadd.f32 -1.4531521, %v235_v41  ;;  %v1161_v17 = vpop.eup %1160  ;;  %v198_v39 = vmul.f32 0.5, %v1270_v52  ;;  %v306_v52 = vld [vmem:[#allocation2 + $0x90] sm:$0xff] }
 0x22d   :  { %v254_v46 = vadd.f32 -0.28449672, %v250_v42  ;;  %v248_v47 = vadd.f32 1.4214138, %v244_v43  ;;  %v249_v49 = vmul.f32 %v1151_v25, %v245_v44  ;;  %v1163_v23 = vpop.eup %1162  ;;  %v197_v42 = vmul.f32 0.5, %v1275_v55  ;;  %v305_v44 = vld [vmem:[#allocation2 + $0x88] sm:$0xff] }
 0x22e   :  { %v243_v50 = vmul.f32 %v1155_v37, %v239_v45  ;;  %v307_v55 = vld [vmem:[#allocation2 + $0x98] sm:$0xff]  ;;  %v400_v45 = vld [vmem:[#allocation2 + $0x50] sm:$0xff] }
 0x22f   :  { %v258_v51 = vmul.f32 %v1149_v20, %v254_v46  ;;  %v252_v53 = vmul.f32 %v1153_v29, %v248_v47  ;;  %v253_v56 = vadd.f32 -0.28449672, %v249_v49 }
 0x230   :  { %v247_v57 = vadd.f32 1.4214138, %v243_v50 }
 0x231   :  { %v262_v58 = vadd.f32 0.2548296, %v258_v51  ;;  %v256_v60 = vadd.f32 -0.28449672, %v252_v53  ;;  %v257_v62 = vmul.f32 %v1151_v25, %v253_v56  ;;  %v401_v51 = vld [vmem:[#allocation2 + $0x58] sm:$0xff] }
 0x232   :  { %v251_v63 = vmul.f32 %v1155_v37, %v247_v57 }
 0x233   :  { %v266_v3 = vmul.f32 %v1149_v20, %v262_v58  ;;  %v260_v6 = vmul.f32 %v1153_v29, %v256_v60  ;;  %v261_v7 = vadd.f32 0.2548296, %v257_v62  ;;  %v402_v62 = vld [vmem:[#allocation2 + $0x60] sm:$0xff] }
 0x234   :  { %v255_v8 = vadd.f32 -0.28449672, %v251_v63 }
 0x235   :  { %v264_v11 = vadd.f32 0.2548296, %v260_v6  ;;  %v265_v12 = vmul.f32 %v1151_v25, %v261_v7  ;;  %v286_v14 = vmul.f32 %v1157_v10, %v266_v3  ;;  %v1209_v25 = vmov -1.0  }
 0x236   :  { %v259_v13 = vmul.f32 %v1155_v37, %v255_v8  ;;  %v212_v26 = vsel %vm208_vm3, 1.0, %v1209_v25  ;;  %v209_v54 = vsel %vm205_vm5, 1.0, %v1209_v25  ;;  %v211_v33 = vsel %vm207_vm6, 1.0, %v1209_v25 }
 0x237   :  { %v268_v16 = vmul.f32 %v1153_v29, %v264_v11  ;;  %v285_v19 = vmul.f32 %v1159_v15, %v265_v12  ;;  %v290_v20 = vsub.f32 1.0, %v286_v14  ;;  %v210_v29 = vsel %vm206_vm4, 1.0, %v1209_v25 }
 0x238   :  { %v263_v18 = vadd.f32 0.2548296, %v259_v13 }
 0x239   :  { %v288_v21 = vmul.f32 %v1161_v17, %v268_v16  ;;  %v289_v28 = vsub.f32 1.0, %v285_v19  ;;  %v294_v31 = vmul.f32 %v290_v20, %v210_v29  ;;  %v464_v20 = vld [vmem:[#allocation2 + $0xb8] sm:$0xff] }
 0x23a   :  { %v267_v22 = vmul.f32 %v1155_v37, %v263_v18  ;;  %1053 = vmatpush3.msra.mxu0 %v464_v20 }
 0x23b   :  { %v292_v24 = vsub.f32 1.0, %v288_v21  ;;  %v293_v35 = vmul.f32 %v289_v28, %v209_v54  ;;  %v298_v38 = vadd.f32 1.0, %v294_v31  ;;  %1054 = vmatprep.subr.mxu0 %v1207_v48 }
 0x23c   :  { %v287_v27 = vmul.f32 %v1163_v23, %v267_v22  ;;  %v463_v23 = vld [vmem:[#allocation2 + $0xb0] sm:$0xff] }
 0x23d   :  { %v296_v30 = vmul.f32 %v292_v24, %v212_v26  ;;  %v297_v41 = vadd.f32 1.0, %v293_v35  ;;  %v302_v61 = vmul.f32 %v298_v38, %v198_v39  ;;  %1055 = vmatpush3.msra.mxu0 %v463_v23  ;;  %v462_v24 = vld [vmem:[#allocation2 + $0xa8] sm:$0xff]  ;;  %v461_v26 = vld [vmem:[#allocation2 + $0xa0] sm:$0xff] }
 0x23e   :  { %v291_v4 = vsub.f32 1.0, %v287_v27  ;;  %1056 = vmatprep.subr.mxu0 %v1207_v48 }
 0x23f   :  { %v300_v59 = vadd.f32 1.0, %v296_v30  ;;  %v301_v43 = vmul.f32 %v297_v41, %v197_v42  ;;  %1057 = vmatpush3.msra.mxu0 %v462_v24 }
 0x240   :  { %v295_v34 = vmul.f32 %v291_v4, %v211_v33  ;;  %1058 = vmatprep.subr.mxu0 %v1207_v48 }
 0x241   :  { %v304_v9 = vmul.f32 %v300_v59, %v200_v32  ;;  %1059 = vmatpush3.msra.mxu0 %v461_v26 }
 0x242   :  { %v299_v37 = vadd.f32 1.0, %v295_v34  ;;  %1094 = vmatprep.subr.mxu0 %v1207_v48  ;;  %v960_v34 = vld [vmem:[#allocation2 + $0x10] ss:$0 sm:$0xff] }
 0x243   :  { %1036 = vmatpush3.msra.mxu1 %v304_v9  ;;  %v961_v9 = vld [vmem:[#allocation2 + $0x18] ss:$0 sm:$0xff] }
 0x244   :  { %1037 = vmatprep.subr.mxu1 %v1207_v48  ;;  %v303_v40 = vmul.f32 %v299_v37, %v199_v36 }
 0x246   :  { %1038 = vmatpush3.msra.mxu1 %v303_v40 }
 0x247   :  { %1039 = vmatprep.subr.mxu1 %v1207_v48 }
 0x248   :  { %1040 = vmatpush3.msra.mxu1 %v302_v61 }
 0x249   :  { %1041 = vmatprep.subr.mxu1 %v1207_v48 }
 0x24a   :  { %1042 = vmatpush3.msra.mxu1 %v301_v43 }
 0x24b   :  { %1044 = vmatmul.mubr.msk.f32.vlgmr.msra.gmra.mxu1 %vm36_vm0, %v305_v44  ;;  %1069 = vmatprep.subr.mxu1 %v1207_v48 }
 0x24c   :  { %1046 = vmatprep.mubr.msk.f32.mxu1 %vm1208_vm2, %v1207_v48 }
 0x24f   :  { %1047 = vmatmul.mubr.msk.f32.gmra.mxu1 %vm36_vm0, %v306_v52  ;;  %v647_v52 = vld [vmem:[#allocation2 + $0x100] sm:$0xff] }
 0x250   :  { %1049 = vmatprep.mubr.msk.f32.mxu1 %vm1208_vm2, %v1207_v48  ;;  %1070 = vmatpush3.msra.mxu1 %v647_v52 }
 0x251   :  { %1071 = vmatprep.subr.mxu1 %v1207_v48 }
 0x253   :  { %1050 = vmatmul.mubr.msk.f32.gmra.mxu1 %vm36_vm0, %v307_v55  ;;  %v646_v55 = vld [vmem:[#allocation2 + $0xf8] sm:$0xff] }
 0x254   :  { %1085 = vmatprep.mubr.msk.f32.mxu1 %vm1208_vm2, %v1207_v48  ;;  %1072 = vmatpush3.msra.mxu1 %v646_v55 }
 0x255   :  { %1073 = vmatprep.subr.mxu1 %v1207_v48 }
 0x30b   :  { %v383_v5 = vpop.f32.mrf.mxu1 }
 0x30c   :  { %v397_v46 = vadd.f32 %v383_v5, %v1246_v2  ;;  %v645_v5 = vld [vmem:[#allocation2 + $0xf0] sm:$0xff] }
 0x30d   :  { %v1045_v47 = vpop.f32.mrf.mxu1  ;;  %1074 = vmatpush3.msra.mxu1 %v645_v5 }
 0x30e   :  { %v1320_v49 = vadd.f32 %v400_v45, %v397_v46  ;;  %1075 = vmatprep.subr.mxu1 %v1207_v48  ;;  %v644_v45 = vld [vmem:[#allocation2 + $0xe8] sm:$0xff]  ;;  %v643_v46 = vld [vmem:[#allocation2 + $0xe0] sm:$0xff]  ;;  %v642_v47 = vld [vmem:[#allocation2 + $0xd8] sm:$0xff] }
 0x30f   :  { %v388_v50 = vpop.f32.mrf.mxu1  ;;  %1076 = vmatpush3.msra.mxu1 %v644_v45 }
 0x310   :  { %v398_v53 = vadd.f32 %v388_v50, %v1241_v1  ;;  %v408_v56 = vsel %vm36_vm0, %v1320_v49, 0.0  ;;  %1077 = vmatprep.subr.mxu1 %v1207_v48  ;;  %v641_v50 = vld [vmem:[#allocation2 + $0xd0] sm:$0xff] }
 0x311   :  { %409 = vadd.xlane.f32.xlu0 %v408_v56  ;;  %v1048_v57 = vpop.f32.mrf.mxu1  ;;  %1078 = vmatpush3.msra.mxu1 %v643_v46  ;;  %v755_v56 = vld [vmem:[#allocation2 + $0x138] sm:$0xff] }
 0x312   :  { %v1325_v58 = vadd.f32 %v401_v51, %v398_v53  ;;  %1079 = vmatprep.subr.mxu1 %v1207_v48  ;;  %v640_v51 = vld [vmem:[#allocation2 + $0xc8] sm:$0xff]  ;;  %v756_v53 = vld [vmem:[#allocation2 + $0x140] sm:$0xff]  ;;  %v754_v57 = vld [vmem:[#allocation2 + $0x130] sm:$0xff] }
 0x313   :  { %v393_v60 = vpop.f32.mrf.mxu1  ;;  %1080 = vmatpush3.msra.mxu1 %v642_v47 }
 0x314   :  { %v399_v63 = vadd.f32 %v393_v60, %v1236_v0  ;;  %v411_v2 = vsel %vm36_vm0, %v1325_v58, 0.0  ;;  %1081 = vmatprep.subr.mxu1 %v1207_v48  ;;  %v753_v60 = vld [vmem:[#allocation2 + $0x128] sm:$0xff] }
 0x315   :  { %412 = vadd.xlane.f32.xlu1 %v411_v2  ;;  %v1051_v3 = vpop.f32.mrf.mxu1  ;;  %1082 = vmatpush3.msra.mxu1 %v641_v50  ;;  %v32_v2 = vld [vmem:[%s1450_s1 + $0x8] sm:$0xff] }
 0x316   :  { %v1330_v6 = vadd.f32 %v402_v62, %v399_v63  ;;  %1083 = vmatprep.subr.mxu1 %v1207_v48  ;;  %v31_v62 = vld [vmem:[%s1450_s1] sm:$0xff] }
 0x317   :  { %1084 = vmatpush3.msra.mxu1 %v640_v51  ;;  %v1367_v63 = vld [vmem:[#allocation2 + $0x120] sm:$0xff] }
 0x318   :  { %v414_v1 = vsel %vm36_vm0, %v1330_v6, 0.0  ;;  %1128 = vmatprep.subr.mxu1 %v1207_v48  ;;  %v962_v3 = vld [vmem:[#allocation2 + $0xc0] ss:$0 sm:$0xff] }
 0x319   :  { %415 = vadd.xlane.f32.xlu0 %v414_v1 }
 0x39a   :  { %v410_v7 = vpop.xlane.xlu0 %409 }
 0x39b   :  { %v417_v8 = vmul.f32 0.03125, %v410_v7 }
 0x39d   :  { %v420_v10 = vsub.f32 %v1320_v49, %v417_v8 }
 0x39e   :  { %v413_v11 = vpop.xlane.xlu1 %412 }
 0x39f   :  { %v418_v12 = vmul.f32 0.03125, %v413_v11  ;;  %v423_v13 = vmul.f32 %v420_v10, %v420_v10 }
 0x3a1   :  { %v421_v0 = vsub.f32 %v1325_v58, %v418_v12  ;;  %v426_v14 = vsel %vm36_vm0, %v423_v13, 0.0 }
 0x3a2   :  { %427 = vadd.xlane.f32.xlu1 %v426_v14  ;;  %v416_v15 = vpop.xlane.xlu0 %415 }
 0x3a3   :  { %v419_v16 = vmul.f32 0.03125, %v416_v15  ;;  %v424_v17 = vmul.f32 %v421_v0, %v421_v0 }
 0x3a5   :  { %v422_v18 = vsub.f32 %v1330_v6, %v419_v16  ;;  %v429_v19 = vsel %vm36_vm0, %v424_v17, 0.0 }
 0x3a6   :  { %430 = vadd.xlane.f32.xlu0 %v429_v19 }
 0x3a7   :  { %v425_v21 = vmul.f32 %v422_v18, %v422_v18 }
 0x3a9   :  { %v432_v22 = vsel %vm36_vm0, %v425_v21, 0.0 }
 0x3aa   :  { %433 = vadd.xlane.f32.xlu1 %v432_v22 }
 0x42b   :  { %v428_v27 = vpop.xlane.xlu1 %427 }
 0x42c   :  { %v435_v28 = vmul.f32 0.03125, %v428_v27 }
 0x42e   :  { %v438_v29 = vadd.f32 1e-05, %v435_v28 }
 0x42f   :  { %v431_v30 = vpop.xlane.xlu0 %430 }
 0x430   :  { %1164 = vrsqrt.f32 %v438_v29  ;;  %v436_v4 = vmul.f32 0.03125, %v431_v30 }
 0x432   :  { %v439_v31 = vadd.f32 1e-05, %v436_v4 }
 0x433   :  { %v434_v54 = vpop.xlane.xlu1 %433 }
 0x434   :  { %1166 = vrsqrt.f32 %v439_v31  ;;  %v437_v32 = vmul.f32 0.03125, %v434_v54 }
 0x436   :  { %v440_v33 = vadd.f32 1e-05, %v437_v32 }
 0x438   :  { %1168 = vrsqrt.f32 %v440_v33 }
 0x43d   :  { %v1165_v59 = vpop.eup %1164 }
 0x43e   :  { %v444_v35 = vmul.f32 %v1165_v59, %v420_v10 }
 0x440   :  { %v451_v36 = vmul.f32 %v960_v34, %v444_v35 }
 0x441   :  { %v1167_v37 = vpop.eup %1166 }
 0x442   :  { %v458_v38 = vadd.f32 %v961_v9, %v451_v36  ;;  %v445_v39 = vmul.f32 %v1167_v37, %v421_v0 }
 0x444   :  { %1061 = vmatmul.mubr.msk.f32.vlgmr.msra.gmra.mxu0 %vm36_vm0, %v458_v38  ;;  %v452_v40 = vmul.f32 %v960_v34, %v445_v39 }
 0x445   :  { %v1169_v41 = vpop.eup %1168  ;;  %1063 = vmatprep.mubr.msk.f32.mxu0 %vm1208_vm2, %v1207_v48  ;;  %1095 = vmatpush3.msra.mxu0 %v756_v53 }
 0x446   :  { %v459_v42 = vadd.f32 %v961_v9, %v452_v40  ;;  %v446_v61 = vmul.f32 %v1169_v41, %v422_v18  ;;  %1096 = vmatprep.subr.mxu0 %v1207_v48 }
 0x447   :  { %1097 = vmatpush3.msra.mxu0 %v755_v56 }
 0x448   :  { %1064 = vmatmul.mubr.msk.f32.gmra.mxu0 %vm36_vm0, %v459_v42  ;;  %v453_v43 = vmul.f32 %v960_v34, %v446_v61  ;;  %1098 = vmatprep.subr.mxu0 %v1207_v48 }
 0x449   :  { %1066 = vmatprep.mubr.msk.f32.mxu0 %vm1208_vm2, %v1207_v48  ;;  %1099 = vmatpush3.msra.mxu0 %v754_v57 }
 0x44a   :  { %v460_v44 = vadd.f32 %v961_v9, %v453_v43  ;;  %1100 = vmatprep.subr.mxu0 %v1207_v48 }
 0x44b   :  { %1101 = vmatpush3.msra.mxu0 %v753_v60 }
 0x44c   :  { %1067 = vmatmul.mubr.msk.f32.gmra.mxu0 %vm36_vm0, %v460_v44  ;;  %1111 = vmatprep.subr.mxu0 %v1207_v48 }
 0x44d   :  { %1102 = vmatprep.mubr.msk.f32.mxu0 %vm1208_vm2, %v1207_v48 }
 0x450   :  { %1103 = vmatmul.mubr.msk.f32.vlgmr.msra.gmra.mxu0 %vm36_vm0, %v31_v62 }
 0x451   :  { %1105 = vmatprep.mubr.msk.f32.mxu0 %vm1208_vm2, %v1207_v48  ;;  %1112 = vmatpush3.msra.mxu0 %v1367_v63 }
 0x452   :  { %1113 = vmatprep.subr.mxu0 %v1207_v48 }
 0x454   :  { %1106 = vmatmul.mubr.msk.f32.gmra.mxu0 %vm36_vm0, %v32_v2 }
 0x455   :  { %1108 = vmatprep.mubr.msk.f32.mxu0 %vm1208_vm2, %v1207_v48 }
 0x504   :  { %v545_v1 = vpop.f32.mrf.mxu0 }
 0x505   :  { %v1381_v7 = vadd.f32 %v962_v3, %v545_v1 }
 0x506   :  { %v1062_v8 = vpop.f32.mrf.mxu0 }
 0x507   :  { %v1384_v10 = vmul.f32 0.70710677, %v1381_v7 }
 0x508   :  { %v550_v11 = vpop.f32.mrf.mxu0 }
 0x509   :  { %v571_v12 = vand.u32 2147483647, %v1384_v10  ;;  %v1387_v13 = vadd.f32 %v962_v3, %v550_v11  ;;  %vm565_vm7 = vcmp.ge.f32.partialorder %v1384_v10, 0.0 }
 0x50a   :  { %v1065_v0 = vpop.f32.mrf.mxu0 }
 0x50b   :  { %v574_v14 = vmul.f32 0.3275911, %v571_v12  ;;  %v1390_v15 = vmul.f32 0.70710677, %v1387_v13  ;;  %v613_v27 = vsub.f32 0.0, %v571_v12 }
 0x50c   :  { %v555_v16 = vpop.f32.mrf.mxu0 }
 0x50d   :  { %v577_v17 = vadd.f32 1.0, %v574_v14  ;;  %v572_v18 = vand.u32 2147483647, %v1390_v15  ;;  %v1393_v19 = vadd.f32 %v962_v3, %v555_v16  ;;  %v616_v29 = vmul.f32 %v613_v27, %v571_v12 }
 0x50e   :  { %v1068_v21 = vpop.f32.mrf.mxu0  ;;  %v568_v12 = vsel %vm565_vm7, 1.0, %v1209_v25  ;;  %vm566_vm8 = vcmp.ge.f32.partialorder %v1390_v15, 0.0 }
 0x50f   :  { %1170 = vrcp.f32 %v577_v17  ;;  %v575_v22 = vmul.f32 0.3275911, %v572_v18  ;;  %v1396_v20 = vmul.f32 0.70710677, %v1393_v19  ;;  %v614_v30 = vsub.f32 0.0, %v572_v18 }
 0x510   :  { %v619_v54 = vmul.f32 1.442695, %v616_v29  ;;  %v569_v10 = vsel %vm566_vm8, 1.0, %v1209_v25  ;;  %v560_v29 = vmul.f32 0.5, %v1387_v13 }
 0x511   :  { %v578_v23 = vadd.f32 1.0, %v575_v22  ;;  %v573_v24 = vand.u32 2147483647, %v1396_v20  ;;  %v617_v32 = vmul.f32 %v614_v30, %v572_v18  ;;  %v559_v18 = vmul.f32 0.5, %v1381_v7 }
 0x512   :  { %vm567_vm10 = vcmp.ge.f32.partialorder %v1396_v20, 0.0  ;;  %v561_v20 = vmul.f32 0.5, %v1393_v19  ;;  %v750_v19 = vld [vmem:[#allocation2 + $0x110] sm:$0xff] }
 0x513   :  { %1172 = vrcp.f32 %v578_v23  ;;  %v576_v26 = vmul.f32 0.3275911, %v573_v24  ;;  %v615_v33 = vsub.f32 0.0, %v573_v24  ;;  %v621_v36 = vmul.f32 1.442695, %v617_v32  ;;  %v749_v32 = vld [vmem:[#allocation2 + $0x108] sm:$0xff] }
 0x515   :  { %v579_v28 = vadd.f32 1.0, %v576_v26  ;;  %v618_v37 = vmul.f32 %v615_v33, %v573_v24  ;;  %v832_v33 = vpop.f32.mrf.mxu0 }
 0x517   :  { %1174 = vrcp.f32 %v579_v28  ;;  %v623_v43 = vmul.f32 1.442695, %v618_v37 }
 0x518   :  { %1176 = vpow2.f32 %v619_v54 }
 0x519   :  { %1178 = vpow2.f32 %v621_v36  ;;  %v969_v36 = vld [vmem:[#allocation2 + $0x20] ss:$0 sm:$0xff] }
 0x51a   :  { %1180 = vpow2.f32 %v623_v43 }
 0x51c   :  { %v1171_v4 = vpop.eup %1170 }
 0x51d   :  { %v586_v31 = vmul.f32 1.0614054, %v1171_v4 }
 0x51f   :  { %v589_v59 = vadd.f32 -1.4531521, %v586_v31 }
 0x520   :  { %v1173_v34 = vpop.eup %1172 }
 0x521   :  { %v592_v35 = vmul.f32 %v1171_v4, %v589_v59  ;;  %v587_v9 = vmul.f32 1.0614054, %v1173_v34  ;;  %v1104_v59 = vpop.f32.mrf.mxu0 }
 0x523   :  { %v595_v38 = vadd.f32 1.4214138, %v592_v35  ;;  %v590_v39 = vadd.f32 -1.4531521, %v587_v9 }
 0x524   :  { %v1175_v40 = vpop.eup %1174 }
 0x525   :  { %v598_v41 = vmul.f32 %v1171_v4, %v595_v38  ;;  %v593_v42 = vmul.f32 %v1173_v34, %v590_v39  ;;  %v588_v61 = vmul.f32 1.0614054, %v1175_v40  ;;  %v1177_v57 = vpop.eup %1176 }
 0x526   :  { %v1179_v11 = vpop.eup %1178 }
 0x527   :  { %v601_v44 = vadd.f32 -0.28449672, %v598_v41  ;;  %v596_v52 = vadd.f32 1.4214138, %v593_v42  ;;  %v591_v55 = vadd.f32 -1.4531521, %v588_v61  ;;  %v1181_v24 = vpop.eup %1180 }
 0x529   :  { %v604_v5 = vmul.f32 %v1171_v4, %v601_v44  ;;  %v599_v45 = vmul.f32 %v1173_v34, %v596_v52  ;;  %v594_v46 = vmul.f32 %v1175_v40, %v591_v55 }
 0x52b   :  { %v607_v47 = vadd.f32 0.2548296, %v604_v5  ;;  %v602_v50 = vadd.f32 -0.28449672, %v599_v45  ;;  %v597_v51 = vadd.f32 1.4214138, %v594_v46 }
 0x52d   :  { %v610_v53 = vmul.f32 %v1171_v4, %v607_v47  ;;  %v605_v56 = vmul.f32 %v1173_v34, %v602_v50  ;;  %v600_v60 = vmul.f32 %v1175_v40, %v597_v51  ;;  %v570_v4 = vsel %vm567_vm10, 1.0, %v1209_v25  ;;  %v33_v25 = vld [vmem:[%s1450_s1 + $0x10] sm:$0xff] }
 0x52e   :  { %1109 = vmatmul.mubr.msk.f32.gmra.mxu0 %vm36_vm0, %v33_v25 }
 0x52f   :  { %v625_v62 = vmul.f32 %v1177_v57, %v610_v53  ;;  %v608_v2 = vadd.f32 0.2548296, %v605_v56  ;;  %v603_v3 = vadd.f32 -0.28449672, %v600_v60  ;;  %1119 = vmatprep.mubr.msk.f32.mxu0 %vm1208_vm2, %v1207_v48 }
 0x531   :  { %v628_v1 = vsub.f32 1.0, %v625_v62  ;;  %v611_v8 = vmul.f32 %v1173_v34, %v608_v2  ;;  %v606_v0 = vmul.f32 %v1175_v40, %v603_v3  ;;  %v837_v34 = vpop.f32.mrf.mxu0 }
 0x533   :  { %v631_v14 = vmul.f32 %v628_v1, %v568_v12  ;;  %v626_v16 = vmul.f32 %v1179_v11, %v611_v8  ;;  %v609_v17 = vadd.f32 0.2548296, %v606_v0  ;;  %v1107_v35 = vpop.f32.mrf.mxu0 }
 0x535   :  { %v634_v21 = vadd.f32 1.0, %v631_v14  ;;  %v629_v22 = vsub.f32 1.0, %v626_v16  ;;  %v612_v23 = vmul.f32 %v1175_v40, %v609_v17 }
 0x537   :  { %v637_v26 = vmul.f32 %v634_v21, %v559_v18  ;;  %v632_v27 = vmul.f32 %v629_v22, %v569_v10  ;;  %v627_v28 = vmul.f32 %v1181_v24, %v612_v23 }
 0x539   :  { %v635_v30 = vadd.f32 1.0, %v632_v27  ;;  %1086 = vmatmul.mubr.msk.f32.vlgmr.msra.gmra.mxu1 %vm648_vm9, %v637_v26  ;;  %v630_v15 = vsub.f32 1.0, %v627_v28 }
 0x53a   :  { %1088 = vmatprep.mubr.msk.f32.mxu1 %vm1208_vm2, %v1207_v48  ;;  %1132 = vmatpush3.msra.mxu1 %v1367_v63  ;;  %v751_v63 = vld [vmem:[#allocation2 + $0x118] sm:$0xff] }
 0x53b   :  { %v638_v7 = vmul.f32 %v635_v30, %v560_v29  ;;  %1129 = vmatprep.subr.mxu1 %v1207_v48  ;;  %v633_v31 = vmul.f32 %v630_v15, %v570_v4  ;;  %1114 = vmatpush3.msra.mxu0 %v751_v63 }
 0x53c   :  { %1133 = vmatpush3.msra.mxu1 %v751_v63  ;;  %1115 = vmatprep.subr.mxu0 %v1207_v48 }
 0x53d   :  { %1089 = vmatmul.mubr.msk.f32.gmra.mxu1 %vm648_vm9, %v638_v7  ;;  %v636_v13 = vadd.f32 1.0, %v633_v31  ;;  %1130 = vmatprep.subr.mxu1 %v1207_v48 }
 0x53e   :  { %1091 = vmatprep.mubr.msk.f32.mxu1 %vm1208_vm2, %v1207_v48  ;;  %1116 = vmatpush3.msra.mxu0 %v750_v19 }
 0x53f   :  { %v639_v54 = vmul.f32 %v636_v13, %v561_v20  ;;  %1134 = vmatpush3.msra.mxu1 %v750_v19  ;;  %1117 = vmatprep.subr.mxu0 %v1207_v48 }
 0x540   :  { %1118 = vmatpush3.msra.mxu0 %v749_v32  ;;  %1131 = vmatprep.subr.mxu1 %v1207_v48 }
 0x541   :  { %1092 = vmatmul.mubr.msk.f32.gmra.mxu1 %vm648_vm9, %v639_v54 }
 0x542   :  { %1122 = vmatprep.mubr.msk.f32.mxu1 %vm1208_vm2, %v1207_v48  ;;  %1135 = vmatpush3.msra.mxu1 %v749_v32 }
 0x5f9   :  { %v724_v9 = vpop.f32.mrf.mxu1 }
 0x5fa   :  { %v738_v37 = vadd.f32 %v724_v9, %v1320_v49  ;;  %v842_v49 = vpop.f32.mrf.mxu0 }
 0x5fb   :  { %v1087_v38 = vpop.f32.mrf.mxu1 }
 0x5fc   :  { %v746_v39 = vadd.f32 %v969_v36, %v738_v37  ;;  %v1110_v5 = vpop.f32.mrf.mxu0 }
 0x5fd   :  { %v729_v40 = vpop.f32.mrf.mxu1 }
 0x5fe   :  { %v739_v41 = vadd.f32 %v729_v40, %v1325_v58  ;;  %1120 = vmatmul.mubr.msk.f32.vlgmr.msra.gmra.mxu0 %vm36_vm0, %v746_v39  ;;  %v976_v58 = vld [vmem:[#allocation2 + $0x28] ss:$0 sm:$0xff] }
 0x5ff   :  { %v1090_v42 = vpop.f32.mrf.mxu1 }
 0x600   :  { %v747_v61 = vadd.f32 %v969_v36, %v739_v41 }
 0x601   :  { %v734_v43 = vpop.f32.mrf.mxu1 }
 0x602   :  { %1123 = vmatmul.mubr.msk.f32.vlgmr.msra.gmra.mxu1 %vm36_vm0, %v747_v61  ;;  %v740_v44 = vadd.f32 %v734_v43, %v1330_v6 }
 0x603   :  { %1125 = vmatprep.mubr.msk.f32.mxu1 %vm1208_vm2, %v1207_v48  ;;  %v1093_v52 = vpop.f32.mrf.mxu1 }
 0x604   :  { %v748_v55 = vadd.f32 %v969_v36, %v740_v44 }
 0x606   :  { %1126 = vmatmul.mubr.msk.f32.gmra.mxu1 %vm36_vm0, %v748_v55 }
 0x6be   :  { %v921_v45 = vpop.f32.mrf.mxu0 }
 0x6bf   :  { %v922_v46 = vadd.f32 %v921_v45, %v832_v33 }
 0x6c0   :  { %v1121_v47 = vpop.f32.mrf.mxu0 }
 0x6c1   :  { %v940_v50 = vadd.f32 %v976_v58, %v922_v46 }
 0x6c2   :  { %v926_v51 = vpop.f32.mrf.mxu1 }
 0x6c3   :  { %943 = vst.msk [vmem:[%s1452_s3] sm:$0xff] %vm36_vm0, %v940_v50  ;;  %v927_v6 = vadd.f32 %v926_v51, %v837_v34 }
 0x6c4   :  { %v1124_v53 = vpop.f32.mrf.mxu1 }
 0x6c5   :  { %v941_v48 = vadd.f32 %v976_v58, %v927_v6 }
 0x6c6   :  { %v931_v56 = vpop.f32.mrf.mxu1 }
 0x6c7   :  { %944 = vst.msk [vmem:[%s1452_s3 + $0x8] sm:$0xff] %vm36_vm0, %v941_v48  ;;  %v932_v57 = vadd.f32 %v931_v56, %v842_v49 }
 0x6c8   :  { %v1127_v60 = vpop.f32.mrf.mxu1 }
 0x6c9   :  { %v942_v62 = vadd.f32 %v976_v58, %v932_v57 }
 0x6cb   :  { %945 = vst.msk [vmem:[%s1452_s3 + $0x10] sm:$0xff] %vm36_vm0, %v942_v62 }
 0x6cc   :  { %950 = vsyncpa [#allocation3], 1 }

</bundles_post_ra>
